<compile_context>
chip_gen: v7x
topology: tpu7x:2x2x1
jax: 0.10.0
libtpu: 0.0.40
codegen_flags: <defaults>
</compile_context>

<pallas_src>
import numpy as np
import jax
import jax.numpy as jnp
from jax.experimental import pallas as pl
from jax.experimental.pallas import tpu as pltpu


# -----------------------------------------------------------------------------
# Diffusion schedule buffers (exactly as in Diffusion.__init__)
# -----------------------------------------------------------------------------
def cosine_beta_schedule(timesteps, s=0.008):
    steps = timesteps + 1
    x = np.linspace(0, steps, steps)
    alphas_cumprod = np.cos(((x / steps) + s) / (1 + s) * np.pi * 0.5) ** 2
    alphas_cumprod = alphas_cumprod / alphas_cumprod[0]
    betas = 1.0 - (alphas_cumprod[1:] / alphas_cumprod[:-1])
    return np.clip(betas, 0.0, 0.999)


def build_diffusion_buffers(timesteps, n_scales, scale_losses, loss_factor, full_train=False):
    betas = cosine_beta_schedule(timesteps)
    alphas = 1.0 - betas
    alphas_cumprod = np.cumprod(alphas, axis=0)
    sqrt_alphas_cumprod = np.sqrt(alphas_cumprod)
    sqrt_one_minus_alphas_cumprod = np.sqrt(1.0 - alphas_cumprod)
    sigma_t = np.sqrt(1.0 - alphas_cumprod) / np.sqrt(alphas_cumprod)

    num_timesteps_trained = [int(timesteps)]
    num_timesteps_ideal = [int(timesteps)]
    for i in range(n_scales - 1):
        ideal = int(np.argmax(sigma_t > loss_factor * scale_losses[i]))
        num_timesteps_ideal.append(ideal)
        num_timesteps_trained.append(int(timesteps) if full_train else ideal)

    gammas = np.zeros((n_scales - 1, timesteps), dtype=np.float32)
    for i in range(n_scales - 1):
        gammas[i, :] = np.clip(sigma_t / (loss_factor * scale_losses[i]), 0.0, 1.0)

    return dict(
        sqrt_alphas_cumprod=jnp.asarray(sqrt_alphas_cumprod, jnp.float32),
        sqrt_one_minus_alphas_cumprod=jnp.asarray(sqrt_one_minus_alphas_cumprod, jnp.float32),
        gammas=jnp.asarray(gammas, jnp.float32),
        num_timesteps_trained=num_timesteps_trained,
    )


# -----------------------------------------------------------------------------
# Pallas kernel: fused mix -> q_sample -> denoise (shared 1x1 conv) -> L1 partials
# -----------------------------------------------------------------------------
def _make_p_losses_kernel(C, tn, with_orig):
    n_fold = tn // 128

    def kernel(*refs):
        if with_orig:
            coef_ref, w_ref, xs_ref, xo_ref, nz_ref, out_ref = refs
        else:
            coef_ref, w_ref, xs_ref, nz_ref, out_ref = refs

        si = pl.program_id(1)  # inner ("arbitrary") lane-step axis

        @pl.when(si == 0)
        def _init():
            out_ref[...] = jnp.zeros_like(out_ref)

        # per-(batch, channel) pre-folded coefficients (tiny resident f32 tile):
        #   col 0: sqrt_acp[t] * gamma_t      (multiplies x_start)
        #   col 1: sqrt_acp[t] * (1 - gamma)  (multiplies x_orig, s > 0 only)
        #   col 2: sqrt_1m_acp[t]             (multiplies noise)
        #   col 3: denoiser time-conditioning bias
        a = coef_ref[:, :, 0:1]                     # (B, C, 1)
        c = coef_ref[:, :, 2:3]

        nz = nz_ref[...].astype(jnp.float32)        # (B, C, tn), f32 math on bf16 data
        x_noisy = a * xs_ref[...].astype(jnp.float32) + c * nz
        if with_orig:
            b = coef_ref[:, :, 1:2]
            x_noisy = x_noisy + b * xo_ref[...].astype(jnp.float32)

        # synthetic denoise_net: shared (C, C) 1x1 conv done as an unrolled VPU
        # broadcast-MAC with scalar weights from SMEM (no kron / no MXU needed at
        # small C; switch to a bf16 MXU matmul if C grows >= 64).
        for o in range(C):
            pred_o = coef_ref[:, o:o + 1, 3:4]      # (B, 1, 1) time bias, lane-broadcast
            for ci in range(C):
                pred_o = pred_o + w_ref[o * C + ci] * x_noisy[:, ci:ci + 1, :]
            d_o = jnp.abs(nz[:, o:o + 1, :] - pred_o)          # (B, 1, tn)
            # lane-fold into a 128-wide partial (aligned slices; VPU has slack)
            part = d_o[:, :, 0:128]
            for j in range(1, n_fold):
                part = part + d_o[:, :, j * 128:(j + 1) * 128]
            out_ref[:, o:o + 1, :] += part           # resident (B, C, 128) accumulator

    return kernel


def _pick_lane_tile(HW, lane_tile):
    """Largest multiple of 128 that divides HW and is <= lane_tile."""
    best, t, cap = 128, 128, min(lane_tile, HW)
    while t <= cap:
        if HW % t == 0:
            best = t
        t += 128
    return best


def p_losses_pallas(x_start_img, x_orig_img, noise_img, a_b, b_b, c_b, tb, w, *, lane_tile=1024):
    """Image tensors are NCHW. x_orig_img may be None (s == 0 path, 2-stream kernel).
    a_b/b_b/c_b are (B,) pre-folded per-batch scalars, tb is the (B, C) denoiser
    time bias, w is the (C, C) 1x1-conv weight."""
    B, C, H, W = x_start_img.shape
    HW = H * W
    # TODO(synk): lane-pad + in-kernel masking for spatial sizes not a multiple of 128.
    assert HW % 128 == 0, "H*W must be a multiple of 128"
    with_orig = x_orig_img is not None

    # Free reshape (contiguous NCHW -> (B, C, H*W)), bf16 to halve HBM read bytes.
    def to_slab(img):
        return img.reshape(B, C, HW).astype(jnp.bfloat16)

    xs = to_slab(x_start_img)
    nz = to_slab(noise_img)
    # TODO(synk): generate noise in-kernel (pltpu.prng_seed + pltpu.stateful_normal)
    # to drop this stream entirely; kept streamed so the loss bit-matches the
    # jax.random reference used for verification.

    # tiny resident coefficient table (B, C, 4) f32
    ones_bc = jnp.ones((B, C), jnp.float32)
    coef = jnp.stack(
        [a_b.astype(jnp.float32)[:, None] * ones_bc,
         b_b.astype(jnp.float32)[:, None] * ones_bc,
         c_b.astype(jnp.float32)[:, None] * ones_bc,
         tb.astype(jnp.float32)],
        axis=-1)

    # shared 1x1-conv weight as a flat SMEM scalar table (no O((B*C)^2) kron weight)
    w_flat = w.astype(jnp.float32).reshape(-1)      # (C*C,)

    tn = _pick_lane_tile(HW, lane_tile)
    steps = HW // tn
    # leading "parallel" axis: 2 independent partial sums -> both v7x TensorCores
    P = 2 if (steps >= 2 and steps % 2 == 0) else 1
    S = steps // P

    lane_spec = lambda pi, si: (0, 0, pi * S + si)
    in_specs = [
        pl.BlockSpec((B, C, 4), lambda pi, si: (0, 0, 0)),          # coef (resident, tiny)
        pl.BlockSpec(memory_space=pltpu.MemorySpace.SMEM),          # w scalar table
        pl.BlockSpec((B, C, tn), lane_spec),                        # x_start (bf16)
    ]
    args = [coef, w_flat, xs]
    if with_orig:
        in_specs.append(pl.BlockSpec((B, C, tn), lane_spec))        # x_orig (bf16)
        args.append(to_slab(x_orig_img))
    in_specs.append(pl.BlockSpec((B, C, tn), lane_spec))            # noise (bf16)
    args.append(nz)

    # explicit VMEM budget (v5e scoped default is 16 MiB; keep well under v7x 64 MiB)
    n_streams = 3 if with_orig else 2
    vmem_need = (2 * n_streams * B * C * tn * 2      # double-buffered bf16 input tiles
                 + 2 * B * C * 128 * 4               # resident partial-sum output
                 + 2 * B * C * 4 * 4)                # coef table
    vmem_limit = int(max(min(2 * vmem_need + (2 << 20), 48 << 20), 16 << 20))
    vmem_limit = max(vmem_limit, vmem_need + (1 << 20))

    out = pl.pallas_call(
        _make_p_losses_kernel(C, tn, with_orig),
        out_shape=jax.ShapeDtypeStruct((P * B, C, 128), jnp.float32),
        grid=(P, S),
        in_specs=in_specs,
        out_specs=pl.BlockSpec((B, C, 128), lambda pi, si: (pi, 0, 0)),
        compiler_params=pltpu.CompilerParams(
            dimension_semantics=("parallel", "arbitrary"),
            vmem_limit_bytes=vmem_limit),
    )(*args)

    # final reduction + normalization outside the kernel (tiny)
    return jnp.sum(out) / float(B * C * HW)


# pure-JAX reference of the same fused math (inputs quantized to bf16 identically)
def p_losses_ref(x_start_img, x_orig_img, noise_img, gamma, sac, somac, tb, w):
    B, C, H, W = x_start_img.shape
    q = lambda x: x.reshape(B, C, -1).astype(jnp.bfloat16).astype(jnp.float32)
    xs = q(x_start_img)
    nz = q(noise_img)
    g = gamma[:, None, None]
    sa = sac[:, None, None]
    so = somac[:, None, None]
    if x_orig_img is None:
        x_mix = xs
    else:
        x_mix = g * xs + (1.0 - g) * q(x_orig_img)
    x_noisy = sa * x_mix + so * nz
    pred = jnp.einsum("oc,bcp->bop", w, x_noisy) + tb[:, :, None]
    return jnp.mean(jnp.abs(nz - pred))


# -----------------------------------------------------------------------------
# `Diffusion.forward` wrapper
# -----------------------------------------------------------------------------
def diffusion_forward(x_list, s, buffers, denoise_params, key, *, lane_tile=1024):
    """x_list: [x_orig, x_recon] (each NCHW) when s > 0, else [x].
    Returns (pallas_loss, reference_loss) for loss_type='l1'."""
    if int(s) > 0:
        x_orig_img, x_start_img = x_list[0], x_list[1]
    else:
        x_orig_img, x_start_img = None, x_list[0]
    B, C, H, W = x_start_img.shape

    k_t, k_noise = jax.random.split(key)
    t = jax.random.randint(k_t, (B,), 0, buffers["num_timesteps_trained"][int(s)])
    noise_img = jax.random.normal(k_noise, x_start_img.shape, jnp.float32)

    sac_t = buffers["sqrt_alphas_cumprod"][t]
    somac_t = buffers["sqrt_one_minus_alphas_cumprod"][t]
    if int(s) > 0:
        gamma_t = buffers["gammas"][int(s) - 1][t]
        a_b = sac_t * gamma_t          # multiplies x_start
        b_b = sac_t * (1.0 - gamma_t)  # multiplies x_orig
    else:
        # s == 0: x_mix == x_start -> fold everything into `a`, drop x_orig stream.
        gamma_t = jnp.ones((B,), jnp.float32)
        a_b = sac_t
        b_b = jnp.zeros((B,), jnp.float32)
    c_b = somac_t                      # multiplies noise

    # synthetic denoise_net conditioning bias: bias[c] + 0.1*sin(t_norm * freq[c])
    w, bias, freqs, timesteps = denoise_params
    t_norm = t.astype(jnp.float32) / float(timesteps)
    tb = bias[None, :] + 0.1 * jnp.sin(t_norm[:, None] * freqs[None, :])  # (B, C)

    loss = p_losses_pallas(x_start_img, x_orig_img, noise_img, a_b, b_b, c_b, tb, w,
                           lane_tile=lane_tile)
    loss_ref = p_losses_ref(x_start_img, x_orig_img, noise_img, gamma_t, sac_t, somac_t, tb, w)
    return loss, loss_ref


if __name__ == "__main__":
    # module config (small shapes): n_scales=2, timesteps=100, channels=4, 16x16 images
    B, C, H, W = 2, 4, 16, 16
    TIMESTEPS = 100
    N_SCALES = 2
    SCALE_LOSSES = [0.1]
    LOSS_FACTOR = 1.0

    buffers = build_diffusion_buffers(TIMESTEPS, N_SCALES, SCALE_LOSSES, LOSS_FACTOR)

    key = jax.random.PRNGKey(0)
    k_xo, k_xr, k_w, k_b, k_fwd0, k_fwd1 = jax.random.split(key, 6)

    x_orig = jax.random.normal(k_xo, (B, C, H, W), jnp.float32)   # NCHW
    x_recon = jax.random.normal(k_xr, (B, C, H, W), jnp.float32)  # NCHW

    # deterministic synthetic denoise_net parameters (built once per run)
    w = 0.2 * jax.random.normal(k_w, (C, C), jnp.float32)
    bias = 0.05 * jax.random.normal(k_b, (C,), jnp.float32)
    freqs = jnp.asarray(np.pi * (np.arange(C) + 1.0), jnp.float32)
    denoise_params = (w, bias, freqs, TIMESTEPS)

    # s > 0 branch (gamma reblurring, 3 input streams); lane_tile=128 forces a
    # 2-step lane grid so the 2-partial "parallel" (dual-TensorCore) path runs.
    loss1, ref1 = diffusion_forward([x_orig, x_recon], 1, buffers, denoise_params,
                                    k_fwd0, lane_tile=128)
    # s == 0 branch: 2-stream kernel variant (x_orig stream dropped).
    loss0, ref0 = diffusion_forward([x_orig], 0, buffers, denoise_params, k_fwd1)

    loss1, ref1, loss0, ref0 = jax.block_until_ready((loss1, ref1, loss0, ref0))

    for lv, rv in ((loss1, ref1), (loss0, ref0)):
        assert jnp.isfinite(lv), "loss is not finite"
        assert abs(float(lv) - float(rv)) < 2e-3, (float(lv), float(rv))
    print("KERNEL_OK")
</pallas_src>

<mosaic_0001>
module attributes {stable_mosaic.version = 11 : i64} {
  func.func @kernel(%arg0: i32, %arg1: i32, %arg2: memref<2x4x4xf32, #tpu.memory_space<vmem>>, %arg3: memref<16xf32, #tpu.memory_space<smem>>, %arg4: memref<2x4x128xbf16, #tpu.memory_space<vmem>>, %arg5: memref<2x4x128xbf16, #tpu.memory_space<vmem>>, %arg6: memref<2x4x128xbf16, #tpu.memory_space<vmem>>, %arg7: memref<2x4x128xf32, #tpu.memory_space<vmem>>) attributes {dimension_semantics = [#tpu.dimension_semantics<parallel>, #tpu.dimension_semantics<arbitrary>], iteration_bounds = array<i64: 2, 1>, scalar_prefetch = 0 : i64, scratch_operands = 0 : i64, tpu.core_type = #tpu.core_type<tc>, window_params = [{pipeline_mode = #tpu.pipeline_mode<synchronous>, transform_indices = @transform_0, window_bounds = array<i64: 2, 4, 4>}, {transform_indices = @transform_1, window_bounds = array<i64: 16>}, {transform_indices = @transform_2, window_bounds = array<i64: 2, 4, 128>}, {transform_indices = @transform_3, window_bounds = array<i64: 2, 4, 128>}, {transform_indices = @transform_4, window_bounds = array<i64: 2, 4, 128>}, {transform_indices = @transform_5, window_bounds = array<i64: 2, 4, 128>}]} {
    %c0_i32 = arith.constant 0 : i32
    %0 = arith.cmpi eq, %arg1, %c0_i32 : i32
    %1 = arith.extui %0 : i1 to i32
    %c0_i32_0 = arith.constant 0 : i32
    %2 = arith.cmpi ne, %1, %c0_i32_0 : i32
    scf.if %2 {
      %cst = arith.constant 0.000000e+00 : f32
      %132 = vector.broadcast %cst : f32 to vector<2x4x128xf32>
      %c0_55 = arith.constant 0 : index
      %c0_56 = arith.constant 0 : index
      %c0_57 = arith.constant 0 : index
      %133 = vector.load %arg7[%c0_55, %c0_56, %c0_57] : memref<2x4x128xf32, #tpu.memory_space<vmem>>, vector<2x4x128xf32>
      tpu.vector_store %arg7[%c0_55, %c0_56, %c0_57], %132 {strides = array<i32>} : memref<2x4x128xf32, #tpu.memory_space<vmem>>, vector<2x4x128xf32>,
    } else {
    }
    %c0 = arith.constant 0 : index
    %c0_1 = arith.constant 0 : index
    %c0_2 = arith.constant 0 : index
    %3 = vector.load %arg2[%c0, %c0_1, %c0_2] : memref<2x4x4xf32, #tpu.memory_space<vmem>>, vector<2x4x1xf32>
    %c0_3 = arith.constant 0 : index
    %c0_4 = arith.constant 0 : index
    %c2 = arith.constant 2 : index
    %4 = vector.load %arg2[%c0_3, %c0_4, %c2] : memref<2x4x4xf32, #tpu.memory_space<vmem>>, vector<2x4x1xf32>
    %c0_5 = arith.constant 0 : index
    %c0_6 = arith.constant 0 : index
    %c0_7 = arith.constant 0 : index
    %5 = vector.load %arg6[%c0_5, %c0_6, %c0_7] : memref<2x4x128xbf16, #tpu.memory_space<vmem>>, vector<2x4x128xbf16>
    %6 = arith.extf %5 : vector<2x4x128xbf16> to vector<2x4x128xf32>
    %c0_8 = arith.constant 0 : index
    %c0_9 = arith.constant 0 : index
    %c0_10 = arith.constant 0 : index
    %7 = vector.load %arg4[%c0_8, %c0_9, %c0_10] : memref<2x4x128xbf16, #tpu.memory_space<vmem>>, vector<2x4x128xbf16>
    %8 = arith.extf %7 : vector<2x4x128xbf16> to vector<2x4x128xf32>
    %9 = vector.broadcast %3 : vector<2x4x1xf32> to vector<2x4x128xf32>
    %10 = arith.mulf %9, %8 : vector<2x4x128xf32>
    %11 = vector.broadcast %4 : vector<2x4x1xf32> to vector<2x4x128xf32>
    %12 = arith.mulf %11, %6 : vector<2x4x128xf32>
    %13 = arith.addf %10, %12 : vector<2x4x128xf32>
    %c0_11 = arith.constant 0 : index
    %c0_12 = arith.constant 0 : index
    %c1 = arith.constant 1 : index
    %14 = vector.load %arg2[%c0_11, %c0_12, %c1] : memref<2x4x4xf32, #tpu.memory_space<vmem>>, vector<2x4x1xf32>
    %c0_13 = arith.constant 0 : index
    %c0_14 = arith.constant 0 : index
    %c0_15 = arith.constant 0 : index
    %15 = vector.load %arg5[%c0_13, %c0_14, %c0_15] : memref<2x4x128xbf16, #tpu.memory_space<vmem>>, vector<2x4x128xbf16>
    %16 = arith.extf %15 : vector<2x4x128xbf16> to vector<2x4x128xf32>
    %17 = vector.broadcast %14 : vector<2x4x1xf32> to vector<2x4x128xf32>
    %18 = arith.mulf %17, %16 : vector<2x4x128xf32>
    %19 = arith.addf %13, %18 : vector<2x4x128xf32>
    %c0_16 = arith.constant 0 : index
    %c0_17 = arith.constant 0 : index
    %c3 = arith.constant 3 : index
    %20 = vector.load %arg2[%c0_16, %c0_17, %c3] : memref<2x4x4xf32, #tpu.memory_space<vmem>>, vector<2x1x1xf32>
    %c0_18 = arith.constant 0 : index
    %21 = memref.load %arg3[%c0_18] : memref<16xf32, #tpu.memory_space<smem>>
    %22 = vector.extract_strided_slice %19 {offsets = [0, 0, 0], sizes = [2, 1, 128], strides = [1, 1, 1]} : vector<2x4x128xf32> to vector<2x1x128xf32>
    %23 = vector.broadcast %21 : f32 to vector<2x1x128xf32>
    %24 = arith.mulf %23, %22 : vector<2x1x128xf32>
    %25 = vector.broadcast %20 : vector<2x1x1xf32> to vector<2x1x128xf32>
    %26 = arith.addf %25, %24 : vector<2x1x128xf32>
    %c1_19 = arith.constant 1 : index
    %27 = memref.load %arg3[%c1_19] : memref<16xf32, #tpu.memory_space<smem>>
    %28 = vector.extract_strided_slice %19 {offsets = [0, 1, 0], sizes = [2, 1, 128], strides = [1, 1, 1]} : vector<2x4x128xf32> to vector<2x1x128xf32>
    %29 = vector.broadcast %27 : f32 to vector<2x1x128xf32>
    %30 = arith.mulf %29, %28 : vector<2x1x128xf32>
    %31 = arith.addf %26, %30 : vector<2x1x128xf32>
    %c2_20 = arith.constant 2 : index
    %32 = memref.load %arg3[%c2_20] : memref<16xf32, #tpu.memory_space<smem>>
    %33 = vector.extract_strided_slice %19 {offsets = [0, 2, 0], sizes = [2, 1, 128], strides = [1, 1, 1]} : vector<2x4x128xf32> to vector<2x1x128xf32>
    %34 = vector.broadcast %32 : f32 to vector<2x1x128xf32>
    %35 = arith.mulf %34, %33 : vector<2x1x128xf32>
    %36 = arith.addf %31, %35 : vector<2x1x128xf32>
    %c3_21 = arith.constant 3 : index
    %37 = memref.load %arg3[%c3_21] : memref<16xf32, #tpu.memory_space<smem>>
    %38 = vector.extract_strided_slice %19 {offsets = [0, 3, 0], sizes = [2, 1, 128], strides = [1, 1, 1]} : vector<2x4x128xf32> to vector<2x1x128xf32>
    %39 = vector.broadcast %37 : f32 to vector<2x1x128xf32>
    %40 = arith.mulf %39, %38 : vector<2x1x128xf32>
    %41 = arith.addf %36, %40 : vector<2x1x128xf32>
    %42 = vector.extract_strided_slice %6 {offsets = [0, 0, 0], sizes = [2, 1, 128], strides = [1, 1, 1]} : vector<2x4x128xf32> to vector<2x1x128xf32>
    %43 = arith.subf %42, %41 : vector<2x1x128xf32>
    %44 = math.absf %43 : vector<2x1x128xf32>
    %c0_22 = arith.constant 0 : index
    %c0_23 = arith.constant 0 : index
    %c0_24 = arith.constant 0 : index
    %45 = vector.load %arg7[%c0_22, %c0_23, %c0_24] : memref<2x4x128xf32, #tpu.memory_space<vmem>>, vector<2x1x128xf32>
    %46 = arith.addf %45, %44 : vector<2x1x128xf32>
    %c0_25 = arith.constant 0 : index
    %c0_26 = arith.constant 0 : index
    %c0_27 = arith.constant 0 : index
    %47 = vector.load %arg7[%c0_25, %c0_26, %c0_27] : memref<2x4x128xf32, #tpu.memory_space<vmem>>, vector<2x1x128xf32>
    tpu.vector_store %arg7[%c0_25, %c0_26, %c0_27], %46 {strides = array<i32>} : memref<2x4x128xf32, #tpu.memory_space<vmem>>, vector<2x1x128xf32>,
    %c0_28 = arith.constant 0 : index
    %c1_29 = arith.constant 1 : index
    %c3_30 = arith.constant 3 : index
    %48 = vector.load %arg2[%c0_28, %c1_29, %c3_30] : memref<2x4x4xf32, #tpu.memory_space<vmem>>, vector<2x1x1xf32>
    %c4 = arith.constant 4 : index
    %49 = memref.load %arg3[%c4] : memref<16xf32, #tpu.memory_space<smem>>
    %50 = vector.extract_strided_slice %19 {offsets = [0, 0, 0], sizes = [2, 1, 128], strides = [1, 1, 1]} : vector<2x4x128xf32> to vector<2x1x128xf32>
    %51 = vector.broadcast %49 : f32 to vector<2x1x128xf32>
    %52 = arith.mulf %51, %50 : vector<2x1x128xf32>
    %53 = vector.broadcast %48 : vector<2x1x1xf32> to vector<2x1x128xf32>
    %54 = arith.addf %53, %52 : vector<2x1x128xf32>
    %c5 = arith.constant 5 : index
    %55 = memref.load %arg3[%c5] : memref<16xf32, #tpu.memory_space<smem>>
    %56 = vector.extract_strided_slice %19 {offsets = [0, 1, 0], sizes = [2, 1, 128], strides = [1, 1, 1]} : vector<2x4x128xf32> to vector<2x1x128xf32>
    %57 = vector.broadcast %55 : f32 to vector<2x1x128xf32>
    %58 = arith.mulf %57, %56 : vector<2x1x128xf32>
    %59 = arith.addf %54, %58 : vector<2x1x128xf32>
    %c6 = arith.constant 6 : index
    %60 = memref.load %arg3[%c6] : memref<16xf32, #tpu.memory_space<smem>>
    %61 = vector.extract_strided_slice %19 {offsets = [0, 2, 0], sizes = [2, 1, 128], strides = [1, 1, 1]} : vector<2x4x128xf32> to vector<2x1x128xf32>
    %62 = vector.broadcast %60 : f32 to vector<2x1x128xf32>
    %63 = arith.mulf %62, %61 : vector<2x1x128xf32>
    %64 = arith.addf %59, %63 : vector<2x1x128xf32>
    %c7 = arith.constant 7 : index
    %65 = memref.load %arg3[%c7] : memref<16xf32, #tpu.memory_space<smem>>
    %66 = vector.extract_strided_slice %19 {offsets = [0, 3, 0], sizes = [2, 1, 128], strides = [1, 1, 1]} : vector<2x4x128xf32> to vector<2x1x128xf32>
    %67 = vector.broadcast %65 : f32 to vector<2x1x128xf32>
    %68 = arith.mulf %67, %66 : vector<2x1x128xf32>
    %69 = arith.addf %64, %68 : vector<2x1x128xf32>
    %70 = vector.extract_strided_slice %6 {offsets = [0, 1, 0], sizes = [2, 1, 128], strides = [1, 1, 1]} : vector<2x4x128xf32> to vector<2x1x128xf32>
    %71 = arith.subf %70, %69 : vector<2x1x128xf32>
    %72 = math.absf %71 : vector<2x1x128xf32>
    %c0_31 = arith.constant 0 : index
    %c1_32 = arith.constant 1 : index
    %c0_33 = arith.constant 0 : index
    %73 = vector.load %arg7[%c0_31, %c1_32, %c0_33] : memref<2x4x128xf32, #tpu.memory_space<vmem>>, vector<2x1x128xf32>
    %74 = arith.addf %73, %72 : vector<2x1x128xf32>
    %c0_34 = arith.constant 0 : index
    %c1_35 = arith.constant 1 : index
    %c0_36 = arith.constant 0 : index
    %75 = vector.load %arg7[%c0_34, %c1_35, %c0_36] : memref<2x4x128xf32, #tpu.memory_space<vmem>>, vector<2x1x128xf32>
    tpu.vector_store %arg7[%c0_34, %c1_35, %c0_36], %74 {strides = array<i32>} : memref<2x4x128xf32, #tpu.memory_space<vmem>>, vector<2x1x128xf32>,
    %c0_37 = arith.constant 0 : index
    %c2_38 = arith.constant 2 : index
    %c3_39 = arith.constant 3 : index
    %76 = vector.load %arg2[%c0_37, %c2_38, %c3_39] : memref<2x4x4xf32, #tpu.memory_space<vmem>>, vector<2x1x1xf32>
    %c8 = arith.constant 8 : index
    %77 = memref.load %arg3[%c8] : memref<16xf32, #tpu.memory_space<smem>>
    %78 = vector.extract_strided_slice %19 {offsets = [0, 0, 0], sizes = [2, 1, 128], strides = [1, 1, 1]} : vector<2x4x128xf32> to vector<2x1x128xf32>
    %79 = vector.broadcast %77 : f32 to vector<2x1x128xf32>
    %80 = arith.mulf %79, %78 : vector<2x1x128xf32>
    %81 = vector.broadcast %76 : vector<2x1x1xf32> to vector<2x1x128xf32>
    %82 = arith.addf %81, %80 : vector<2x1x128xf32>
    %c9 = arith.constant 9 : index
    %83 = memref.load %arg3[%c9] : memref<16xf32, #tpu.memory_space<smem>>
    %84 = vector.extract_strided_slice %19 {offsets = [0, 1, 0], sizes = [2, 1, 128], strides = [1, 1, 1]} : vector<2x4x128xf32> to vector<2x1x128xf32>
    %85 = vector.broadcast %83 : f32 to vector<2x1x128xf32>
    %86 = arith.mulf %85, %84 : vector<2x1x128xf32>
    %87 = arith.addf %82, %86 : vector<2x1x128xf32>
    %c10 = arith.constant 10 : index
    %88 = memref.load %arg3[%c10] : memref<16xf32, #tpu.memory_space<smem>>
    %89 = vector.extract_strided_slice %19 {offsets = [0, 2, 0], sizes = [2, 1, 128], strides = [1, 1, 1]} : vector<2x4x128xf32> to vector<2x1x128xf32>
    %90 = vector.broadcast %88 : f32 to vector<2x1x128xf32>
    %91 = arith.mulf %90, %89 : vector<2x1x128xf32>
    %92 = arith.addf %87, %91 : vector<2x1x128xf32>
    %c11 = arith.constant 11 : index
    %93 = memref.load %arg3[%c11] : memref<16xf32, #tpu.memory_space<smem>>
    %94 = vector.extract_strided_slice %19 {offsets = [0, 3, 0], sizes = [2, 1, 128], strides = [1, 1, 1]} : vector<2x4x128xf32> to vector<2x1x128xf32>
    %95 = vector.broadcast %93 : f32 to vector<2x1x128xf32>
    %96 = arith.mulf %95, %94 : vector<2x1x128xf32>
    %97 = arith.addf %92, %96 : vector<2x1x128xf32>
    %98 = vector.extract_strided_slice %6 {offsets = [0, 2, 0], sizes = [2, 1, 128], strides = [1, 1, 1]} : vector<2x4x128xf32> to vector<2x1x128xf32>
    %99 = arith.subf %98, %97 : vector<2x1x128xf32>
    %100 = math.absf %99 : vector<2x1x128xf32>
    %c0_40 = arith.constant 0 : index
    %c2_41 = arith.constant 2 : index
    %c0_42 = arith.constant 0 : index
    %101 = vector.load %arg7[%c0_40, %c2_41, %c0_42] : memref<2x4x128xf32, #tpu.memory_space<vmem>>, vector<2x1x128xf32>
    %102 = arith.addf %101, %100 : vector<2x1x128xf32>
    %c0_43 = arith.constant 0 : index
    %c2_44 = arith.constant 2 : index
    %c0_45 = arith.constant 0 : index
    %103 = vector.load %arg7[%c0_43, %c2_44, %c0_45] : memref<2x4x128xf32, #tpu.memory_space<vmem>>, vector<2x1x128xf32>
    tpu.vector_store %arg7[%c0_43, %c2_44, %c0_45], %102 {strides = array<i32>} : memref<2x4x128xf32, #tpu.memory_space<vmem>>, vector<2x1x128xf32>,
    %c0_46 = arith.constant 0 : index
    %c3_47 = arith.constant 3 : index
    %c3_48 = arith.constant 3 : index
    %104 = vector.load %arg2[%c0_46, %c3_47, %c3_48] : memref<2x4x4xf32, #tpu.memory_space<vmem>>, vector<2x1x1xf32>
    %c12 = arith.constant 12 : index
    %105 = memref.load %arg3[%c12] : memref<16xf32, #tpu.memory_space<smem>>
    %106 = vector.extract_strided_slice %19 {offsets = [0, 0, 0], sizes = [2, 1, 128], strides = [1, 1, 1]} : vector<2x4x128xf32> to vector<2x1x128xf32>
    %107 = vector.broadcast %105 : f32 to vector<2x1x128xf32>
    %108 = arith.mulf %107, %106 : vector<2x1x128xf32>
    %109 = vector.broadcast %104 : vector<2x1x1xf32> to vector<2x1x128xf32>
    %110 = arith.addf %109, %108 : vector<2x1x128xf32>
    %c13 = arith.constant 13 : index
    %111 = memref.load %arg3[%c13] : memref<16xf32, #tpu.memory_space<smem>>
    %112 = vector.extract_strided_slice %19 {offsets = [0, 1, 0], sizes = [2, 1, 128], strides = [1, 1, 1]} : vector<2x4x128xf32> to vector<2x1x128xf32>
    %113 = vector.broadcast %111 : f32 to vector<2x1x128xf32>
    %114 = arith.mulf %113, %112 : vector<2x1x128xf32>
    %115 = arith.addf %110, %114 : vector<2x1x128xf32>
    %c14 = arith.constant 14 : index
    %116 = memref.load %arg3[%c14] : memref<16xf32, #tpu.memory_space<smem>>
    %117 = vector.extract_strided_slice %19 {offsets = [0, 2, 0], sizes = [2, 1, 128], strides = [1, 1, 1]} : vector<2x4x128xf32> to vector<2x1x128xf32>
    %118 = vector.broadcast %116 : f32 to vector<2x1x128xf32>
    %119 = arith.mulf %118, %117 : vector<2x1x128xf32>
    %120 = arith.addf %115, %119 : vector<2x1x128xf32>
    %c15 = arith.constant 15 : index
    %121 = memref.load %arg3[%c15] : memref<16xf32, #tpu.memory_space<smem>>
    %122 = vector.extract_strided_slice %19 {offsets = [0, 3, 0], sizes = [2, 1, 128], strides = [1, 1, 1]} : vector<2x4x128xf32> to vector<2x1x128xf32>
    %123 = vector.broadcast %121 : f32 to vector<2x1x128xf32>
    %124 = arith.mulf %123, %122 : vector<2x1x128xf32>
    %125 = arith.addf %120, %124 : vector<2x1x128xf32>
    %126 = vector.extract_strided_slice %6 {offsets = [0, 3, 0], sizes = [2, 1, 128], strides = [1, 1, 1]} : vector<2x4x128xf32> to vector<2x1x128xf32>
    %127 = arith.subf %126, %125 : vector<2x1x128xf32>
    %128 = math.absf %127 : vector<2x1x128xf32>
    %c0_49 = arith.constant 0 : index
    %c3_50 = arith.constant 3 : index
    %c0_51 = arith.constant 0 : index
    %129 = vector.load %arg7[%c0_49, %c3_50, %c0_51] : memref<2x4x128xf32, #tpu.memory_space<vmem>>, vector<2x1x128xf32>
    %130 = arith.addf %129, %128 : vector<2x1x128xf32>
    %c0_52 = arith.constant 0 : index
    %c3_53 = arith.constant 3 : index
    %c0_54 = arith.constant 0 : index
    %131 = vector.load %arg7[%c0_52, %c3_53, %c0_54] : memref<2x4x128xf32, #tpu.memory_space<vmem>>, vector<2x1x128xf32>
    tpu.vector_store %arg7[%c0_52, %c3_53, %c0_54], %130 {strides = array<i32>} : memref<2x4x128xf32, #tpu.memory_space<vmem>>, vector<2x1x128xf32>,
    return
  }
  func.func @transform_0(%arg0: i32, %arg1: i32) -> (i32, i32, i32) {
    %c0_i32 = arith.constant 0 : i32
    %c0_i32_0 = arith.constant 0 : i32
    %c0_i32_1 = arith.constant 0 : i32
    %c0_i32_2 = arith.constant 0 : i32
    return %c0_i32, %c0_i32_0, %c0_i32_1 : i32, i32, i32
  }
  func.func @transform_1(%arg0: i32, %arg1: i32) -> i32 {
    %c0_i32 = arith.constant 0 : i32
    %c0_i32_0 = arith.constant 0 : i32
    return %c0_i32 : i32
  }
  func.func @transform_2(%arg0: i32, %arg1: i32) -> (i32, i32, i32) {
    %c1_i32 = arith.constant 1 : i32
    %0 = arith.muli %arg0, %c1_i32 : i32
    %1 = arith.addi %0, %arg1 : i32
    %c0_i32 = arith.constant 0 : i32
    %c0_i32_0 = arith.constant 0 : i32
    %c0_i32_1 = arith.constant 0 : i32
    return %c0_i32, %c0_i32_0, %1 : i32, i32, i32
  }
  func.func @transform_3(%arg0: i32, %arg1: i32) -> (i32, i32, i32) {
    %c1_i32 = arith.constant 1 : i32
    %0 = arith.muli %arg0, %c1_i32 : i32
    %1 = arith.addi %0, %arg1 : i32
    %c0_i32 = arith.constant 0 : i32
    %c0_i32_0 = arith.constant 0 : i32
    %c0_i32_1 = arith.constant 0 : i32
    return %c0_i32, %c0_i32_0, %1 : i32, i32, i32
  }
  func.func @transform_4(%arg0: i32, %arg1: i32) -> (i32, i32, i32) {
    %c1_i32 = arith.constant 1 : i32
    %0 = arith.muli %arg0, %c1_i32 : i32
    %1 = arith.addi %0, %arg1 : i32
    %c0_i32 = arith.constant 0 : i32
    %c0_i32_0 = arith.constant 0 : i32
    %c0_i32_1 = arith.constant 0 : i32
    return %c0_i32, %c0_i32_0, %1 : i32, i32, i32
  }
  func.func @transform_5(%arg0: i32, %arg1: i32) -> (i32, i32, i32) {
    %c0_i32 = arith.constant 0 : i32
    %c0_i32_0 = arith.constant 0 : i32
    %c0_i32_1 = arith.constant 0 : i32
    return %arg0, %c0_i32, %c0_i32_0 : i32, i32, i32
  }
}

</mosaic_0001>

<bundles_post_ra>
// kernel: tpu_custom_call.1
= control target key start
LH: loop header
LB: loop body
LE: loop exit
PB: predicated region body
PF: predicated region fallthrough
CT: control target
= control target key end

     0   :  { %s1765_s0 = inlined_call_operand.hbm [shape: f32[2,4,4], index: 0, kind: input, shape index: {}]   ;;  %s1766_s1 = inlined_call_operand.vmem [shape: f32[16], index: 1, kind: input, shape index: {}]   ;;  %s1767_s2 = inlined_call_operand.hbm [shape: bf16[2,4,256], index: 2, kind: input, shape index: {}]   ;;  %s1768_s3 = inlined_call_operand.vmem [shape: bf16[2,4,256], index: 3, kind: input, shape index: {}]   ;;  %s1769_s4 = inlined_call_operand.hbm [shape: bf16[2,4,256], index: 4, kind: input, shape index: {}]   ;;  %s1770_s5 = inlined_call_operand.hbm [shape: f32[4,4,128], index: 5, kind: output, shape index: {}]  }
   0x1   :  { %1778 = sst [smem:[#allocation16_spill]] %s1765_s0 }
   0x2   :  { %1779 = sst [smem:[#allocation17_spill]] %s1766_s1 }
   0x3   :  { %1780 = sst [smem:[#allocation18_spill]] %s1767_s2 }
   0x4   :  { %10 = vsyncpa [#allocation3], 0 }
   0x5   :  { %11 = vsyncpa [#allocation5], 0 }
   0x6   :  { %12 = vsyncpa [#allocation8], 0 }
   0x7   :  { %14 = vsyncpa [#allocation8 + $0x1], 0 }
   0x8   :  { %15 = vsyncpa [#allocation4], 0 }
   0x9   :  { %17 = vsyncpa [#allocation4 + $0x1], 0  ;;  %s1291_s18 = smov 0   ;;  %s1293_s19 = smov 0  }
   0xa   :  { %s1295_s20 = smov 0   ;;  %s1297_s21 = smov 0  }
   0xb   :  { %s1299_s22 = smov 0   ;;  %s1301_s23 = smov 0  }
   0xc LB: > { %s1322_s24 = sadd.s32 4294967295, %s1242_s23   ;;  %s916_s25 = sadd.s32 4294967294, %s1242_s23   ;;  %s1242_s23 = sphi %s1301_s23, %s23_s23   ;;  %s1238_s22 = sphi %s1299_s22, %s1805_s22   ;;  %s1234_s21 = sphi %s1297_s21, %s1804_s21   ;;  %s1230_s20 = sphi %s1295_s20, %s1803_s20   ;;  %s1226_s19 = sphi %s1293_s19, %s1802_s19   ;;  %s1222_s18 = sphi %s1291_s18, %s1801_s18  }
   0xd   : > { %s35_s26 = sadd.s32 1, %s1238_s22  ;;  %s86_s27 = sadd.s32 1, %s1230_s20 }
   0xe   : > { %p37_p0 = scmp.ge.s32.totalorder %s35_s26, 2  ;;  %p93_p1 = scmp.ne.s32.totalorder %s1230_s20, %s1226_s19 }
   0xf   : > { %p94_p2 = scmp.eq.s32.totalorder %s1242_s23, 0  ;;  %p99_p3 = scmp.ne.s32.totalorder %s1226_s19, %s1222_s18 }
  0x10   : > { %s1807_s26 = smov (%p37_p0, %s35_s26), 0  ;;  %p1771_p5 = scmp.eq.s32.totalorder %s1322_s24, 0 }
  0x11   : > { %p1334_p4 = por %p94_p2, %p93_p1  ;;  %s83_s29 = ssub.s32 %s1238_s22, %s1807_s26 }
  0x12   : > { %p179_p6 = scmp.eq.s32.totalorder %s1322_s24, 1  ;;  %p84_p7 = scmp.eq.s32.totalorder %s83_s29, 0 }
  0x13   : > { %s1781_s28 = scalar_select %p1334_p4, 1, 0 }
  0x14   : > { %p1344_p8 = por %p1771_p5, %p99_p3  ;;  %p1348_p9 = por %p179_p6, %p93_p1 }
  0x15   : > { %p185_p10 = scmp.eq.s32.totalorder %s916_s25, 1  ;;  %p917_p12 = scmp.ge.s32.totalorder %s1242_s23, 1 }
  0x16   : > { %s1782_s30 = scalar_select %p1344_p8, 1, 0 }
  0x17   : > { %s1783_s6 = scalar_select %p1348_p9, 1, 0 }
  0x18   : > { %s1353_s7 = scalar_select %p84_p7, %s1230_s20, %s86_s27  }
  0x19   : > { %p1355_p11 = por %p185_p10, %p99_p3  ;;  %p192_p13 = scmp.lt.s32.totalorder %s1242_s23, 3 }
  0x1a   : > { %s1244_s10 = smov [#allocation2]   ;;  %s1786_s1 = sld [smem:[#allocation17_spill]] }
  0x1b   : > { %s1784_s8 = scalar_select %p1355_p11, 1, 0 }
  0x1c   : > { %p1361_p0 = pnand %p917_p12, %p192_p13  ;;  %s204_s11 = sshll.u32 %s1244_s10, 4  ;;  %s205_s11 = int_to_ptr.vmem [resolvable:$true] %s204_s11 }
  0x1d   : > { %s1788_s0 = sld [smem:[#allocation16_spill]] }
  0x1e   : > { %s1785_s9 = scalar_select %p1361_p0, 1, 0 }
  0x1f   : > { %p969_p1 = pneg %p1361_p0 }
  0x20   : > { %s218_s14 = sshll.u32 %s1786_s1, 4  ;;  %s1376_s14 = int_to_ptr.vmem [resolvable:$true] %s218_s14 }
  0x21   : > { %p1372_p2 = pnand %p969_p1, %p1771_p5 }
  0x23   : > { %s1053_s25 = scalar_lea.hbm %s1788_s0, 128  ;;  %p1055_p6 = pneg %p1372_p2 }
  0x24   : > { %p1054_p3 = scmp.ne.s32.totalorder %s1788_s0, %s1053_s25  ;;  %p1060_p12 = scmp.lt.u32.totalorder %s1053_s25, %s1788_s0 }
  0x26   : > { %p1056_p7 = pnand %p1055_p6, %p1054_p3 }
  0x28   : > { %p1057_p10 = pneg %p1056_p7 }
  0x2a   : > { %p1062_p13 = pnand %p1060_p12, %p1057_p10 }
  0x2c   : > { %1065 = shalt.err (!%p1062_p13)
}
  0x2d   : > { %s1066_s13 = scalar_lea.vmem %s205_s11, 128  ;;  %p1074_p9 = scmp.lt.s32.totalorder %s205_s11, %s205_s11 }
  0x2e   : > { %p1067_p1 = scmp.ne.s32.totalorder %s205_s11, %s1066_s13  ;;  %p1075_p8 = scmp.lt.s32.totalorder %s1066_s13, %s1066_s13 }
  0x30   : > { %p1069_p5 = pnand %p1067_p1, %p1055_p6  ;;  %p1076_p0 = por %p1075_p8, %p1074_p9 }
  0x32   : > { %p1070_p11 = pneg %p1069_p5 }
  0x34   : > { %p1077_p4 = pnand %p1076_p0, %p1070_p11 }
  0x36   : > { %1080 = shalt.err (!%p1077_p4)
}
  0x37   : > { %s1245_s16 = smov 64   ;;  %s1246_s17 = smov 4  }
  0x38   : > { %972 = dma.hbm_to_vmem [thread:$0]  (!%p1372_p2), %s1788_s0, 128, %s205_s11, [#allocation3], %s1245_s16, %s1245_s16, %s1246_s17  }
  0x39   : > { %s1081_s29 = scalar_lea.vmem %s1376_s14, 16  ;;  %p1089_p4 = scmp.lt.s32.totalorder %s1376_s14, %s1376_s14 }
  0x3a   : > { %p1082_p3 = scmp.ne.s32.totalorder %s1376_s14, %s1081_s29  ;;  %p1090_p9 = scmp.lt.s32.totalorder %s1081_s29, %s1081_s29 }
  0x3c   : > { %p1084_p5 = pnand %p1082_p3, %p1055_p6  ;;  %p1091_p11 = por %p1090_p9, %p1089_p4 }
  0x3e   : > { %p1085_p8 = pneg %p1084_p5 }
  0x40   : > { %p1092_p0 = pnand %p1091_p11, %p1085_p8 }
  0x42   : > { %1095 = shalt.err (!%p1092_p0)
}
  0x43   : > { %s1247_s10 = smov [#allocation6]   ;;  %p920_p7 = scmp.ge.s32.totalorder %s1242_s23, 2 }
  0x44   : > { %975 = dma.vmem_to_smem (!%p1372_p2), %s1376_s14, 16, %s1247_s10, [#allocation5]  }
  0x45   : > { %225 = sbr.rel (%p920_p7) target bundleno = 130 (0x82), region = 24  ;;  %s229_s11 = sand.u32 (!%p920_p7), 1, %s1242_s23  }
  0x46   : > { %s231_s12 = sand.u32 (!%p920_p7), 1, %s1230_s20   ;;  %s1777_s16 = sshll.u32 (!%p920_p7), %s1238_s22, 5 }
  0x47   : > { %s1415_s13 = sshll.u32 (!%p920_p7), %s231_s12, 2  ;;  %s1789_s2 = sld [smem:[#allocation18_spill]] (!%p920_p7) }
  0x48   : > { %s233_s25 = scalar_lea.vmem (!%p920_p7), [#allocation7], %s1415_s13  ;;  %s1428_s29 = scalar_lea.sflag (!%p920_p7), [#allocation8], %s229_s11 }
  0x49   : > { %s240_s27 = sshll.u32 (!%p920_p7), %s233_s25, 4  ;;  %p1790_p6 = scmp.ne.s32.totalorder (!%p920_p7), %s1781_s28, 0  ;;  %s1426_s27 = int_to_ptr.vmem [resolvable:$true] %s240_s27 }
  0x4d   : > { %s1423_s14 = scalar_lea.hbm %s1789_s2, %s1777_s16  ;;  %s1100_s15 = scalar_lea.hbm %s1789_s2, 128 }
  0x4e   : > { %s1096_s10 = scalar_lea.hbm %s1423_s14, 64  ;;  %p1101_p13 = scmp.lt.u32.totalorder %s1423_s14, %s1789_s2 }
  0x4f   : > { %p1097_p2 = scmp.ne.s32.totalorder %s1423_s14, %s1096_s10  ;;  %p1102_p1 = scmp.lt.u32.totalorder %s1100_s15, %s1096_s10 }
  0x50   : > { %p1104_p5 = scmp.lt.u32.totalorder %s1096_s10, %s1423_s14 }
  0x51   : > { %p1098_p10 = pnand %p1097_p2, %p1790_p6  ;;  %p1103_p3 = por %p1102_p1, %p1101_p13 }
  0x53   : > { %p1099_p12 = pneg %p1098_p10  ;;  %p1105_p8 = por %p1104_p5, %p1103_p3 }
  0x55   : > { %p1106_p4 = pnand %p1105_p8, %p1099_p12 }
  0x57   : > { %1109 = shalt.err (!%p1106_p4)
}
  0x58   : > { %s1110_s11 = scalar_lea.vmem %s1426_s27, 64  ;;  %s1248_s0 = smov [#allocation7]  }
  0x59   : > { %p1111_p9 = scmp.ne.s32.totalorder %s1426_s27, %s1110_s11  ;;  %s1114_s25 = sshll.u32 %s1248_s0, 4  ;;  %s1115_s25 = int_to_ptr.vmem [resolvable:$false] %s1114_s25 }
  0x5a   : > { %s1116_s16 = scalar_lea.vmem %s1115_s25, 128  ;;  %p1117_p2 = scmp.lt.s32.totalorder %s1426_s27, %s1115_s25 }
  0x5b   : > { %p1112_p11 = pnand %p1111_p9, %p1790_p6  ;;  %p1118_p10 = scmp.lt.s32.totalorder %s1116_s16, %s1110_s11 }
  0x5d   : > { %p1113_p0 = pneg %p1112_p11  ;;  %p1119_p13 = por %p1118_p10, %p1117_p2 }
  0x5f   : > { %p1120_p1 = pnand %p1119_p13, %p1113_p0 }
  0x61   : > { %1123 = shalt.err (!%p1120_p1)
}
  0x62   : > { %s1249_s10 = smov 64   ;;  %s1250_s12 = smov 32  }
  0x63   : > { %s1251_s15 = smov 2   ;;  %249 = sbr.rel (!%p1790_p6) target bundleno = 106 (0x6a), region = 32 }
  0x64   : > { %959 = dma.hbm_to_vmem [thread:$0]  (%p1790_p6), %s1423_s14, 64, %s1426_s27, %s1428_s29, %s1249_s10, %s1250_s12, %s1251_s15  }
  0x65   : > { %s924_s17 = sshll.u32 (%p1790_p6), %s1238_s22, 1  ;;  %s253_s16 = scalar_lea.vmem (%p1790_p6), [#allocation9], %s1415_s13 }
  0x66   : > { %s256_s25 = scalar_lea.vmem (%p1790_p6), %s1768_s3, %s924_s17 }
  0x67   : > { %v272_v0 = vld [vmem:[%s256_s25] sm:$0x3] (%p1790_p6)  ;;  %v274_v1 = vld [vmem:[%s256_s25 + $0x4] sm:$0x3] (%p1790_p6) }
  0x68   : > { %273 = vst [vmem:[%s253_s16] sm:$0x3] (%p1790_p6), %v272_v0  ;;  %275 = vst [vmem:[%s253_s16 + $0x2] sm:$0x3] (%p1790_p6), %v274_v1 }
  0x6a PF: > { %s1791_s1 = sshll.u32 %s1238_s22, 5  ;;  %s299_s17 = scalar_lea.vmem [#allocation10], %s1415_s13 }
  0x6b   : > { %s1467_s27 = scalar_lea.hbm %s1769_s4, %s1791_s1  ;;  %s306_s11 = sshll.u32 %s299_s17, 4  ;;  %s1470_s11 = int_to_ptr.vmem [resolvable:$true] %s306_s11 }
  0x6c   : > { %s1124_s0 = scalar_lea.hbm %s1467_s27, 64  ;;  %p1792_p12 = scmp.ne.s32.totalorder %s1781_s28, 0 }
  0x6d   : > { %p1125_p6 = scmp.ne.s32.totalorder %s1467_s27, %s1124_s0  ;;  %s1128_s2 = scalar_lea.hbm %s1769_s4, 128 }
  0x6e   : > { %p1129_p8 = scmp.lt.u32.totalorder %s1467_s27, %s1769_s4  ;;  %p1130_p4 = scmp.lt.u32.totalorder %s1128_s2, %s1124_s0 }
  0x6f   : > { %p1126_p3 = pnand %p1125_p6, %p1792_p12  ;;  %p1132_p11 = scmp.lt.u32.totalorder %s1124_s0, %s1467_s27 }
  0x70   : > { %p1131_p9 = por %p1130_p4, %p1129_p8 }
  0x71   : > { %p1127_p5 = pneg %p1126_p3 }
  0x72   : > { %p1133_p0 = por %p1132_p11, %p1131_p9 }
  0x74   : > { %p1134_p2 = pnand %p1133_p0, %p1127_p5 }
  0x76   : > { %1137 = shalt.err (!%p1134_p2)
}
  0x77   : > { %s1138_s13 = scalar_lea.vmem %s1470_s11, 64  ;;  %s1252_s17 = smov [#allocation10]  }
  0x78   : > { %p1139_p10 = scmp.ne.s32.totalorder %s1470_s11, %s1138_s13  ;;  %s1142_s25 = sshll.u32 %s1252_s17, 4  ;;  %s1143_s25 = int_to_ptr.vmem [resolvable:$false] %s1142_s25 }
  0x79   : > { %s1144_s16 = scalar_lea.vmem %s1143_s25, 128  ;;  %p1145_p6 = scmp.lt.s32.totalorder %s1470_s11, %s1143_s25 }
  0x7a   : > { %p1140_p13 = pnand %p1139_p10, %p1792_p12  ;;  %p1146_p3 = scmp.lt.s32.totalorder %s1144_s16, %s1138_s13 }
  0x7c   : > { %p1141_p1 = pneg %p1140_p13  ;;  %p1147_p8 = por %p1146_p3, %p1145_p6 }
  0x7e   : > { %p1148_p4 = pnand %p1147_p8, %p1141_p1 }
  0x80   : > { %1151 = shalt.err (!%p1148_p4)
}
  0x81   : > { %960 = dma.hbm_to_vmem [thread:$0]  (%p1792_p12), %s1467_s27, 64, %s1470_s11, %s1428_s29, %s1249_s10, %s1250_s12, %s1251_s15  }
  0x82 PF: > { %p1793_p5 = scmp.ne.s32.totalorder %s1785_s9, 0 }
  0x83   : > { %p1794_p9 = scmp.eq.s32.totalorder (!%p1793_p5), %s1322_s24, 0 }
  0x84   : > { %318 = sbr.rel (%p1793_p5) target bundleno = 348 (0x15c), region = 70 }
  0x8b   : > { %1205 = dma.done.wait (%p1794_p9), [#allocation3], 128   ;;  %p1795_p11 = pmov %p1794_p9 }
  0x8c   : > { %p1796_p0 = pmov %p1794_p9 }
  0x8d   : > { %1207 = vsyncadd (%p1795_p11), [#allocation3], 4294967168 }
  0x8e   : > { %1209 = dma.done.wait (%p1796_p0), [#allocation5], 16   ;;  %p1797_p2 = pmov %p1796_p0 }
  0x8f   : > { %s328_s28 = sand.u32 1, %s1322_s24   ;;  %s1509_s29 = sand.u32 1, %s1226_s19  }
  0x90   : > { %1211 = vsyncadd (%p1797_p2), [#allocation5], 4294967280  ;;  %s1512_s9 = sshll.u32 %s1509_s29, 2  ;;  %s329_s10 = scalar_lea.sflag [#allocation8], %s328_s28 }
  0x91   : > { %s332_s12 = scalar_lea.vmem [#allocation7], %s1512_s9  ;;  %p1798_p12 = scmp.ne.s32.totalorder %s1782_s30, 0 }
  0x93   : > { %1213 = dma.done.wait (%p1798_p12), %s329_s10, 128  }
  0x94   : > { %1215 = vsyncadd (%p1798_p12), %s329_s10, 4294967168  ;;  %s340_s15 = scalar_lea.vmem [#allocation9], %s1512_s9  ;;  %s348_s27 = scalar_lea.vmem [#allocation10], %s1512_s9 }
  0x95   : > { %353 = sfence }
  0x96   : > { %v395_v2 = vld [vmem:[#allocation2] sm:$0xf]  ;;  %v1253_v3 = vmov 2   ;;  %v1254_v4 = vmov 0   ;;  %v396_v5 = vld [vmem:[#allocation2 + $0x4] sm:$0xf]  ;;  %v577_v24 = vlaneseq }
  0x97   : > { %1048 = vset.pattern.permute.xlu1 %v1253_v3  ;;  %1047 = vset.pattern.permute.xlu0 %v1254_v4  ;;  %v1255_v6 = vmov 1   ;;  %v509_v7 = vld [vmem:[#allocation2 + $0x1] sm:$0x1]  ;;  %v510_v8 = vld [vmem:[#allocation2 + $0x5] sm:$0x1]  ;;  %v1256_v9 = vmov 3  }
  0x98   : > { %418 = vperm.xlu1 %1048, %v395_v2   ;;  %407 = vperm.xlu0 %1047, %v395_v2   ;;  %s933_s24 = sshll.u32 %s1509_s29, 3  ;;  %v591_v10 = vld [vmem:[#allocation2 + $0x2] sm:$0x1]  ;;  %v673_v11 = vld [vmem:[#allocation2 + $0x3] sm:$0x1]  ;;  %v1257_v12 = vmov 0.0  }
  0x99   : > { %s1522_s30 = scalar_lea.vmem [#allocation11], %s933_s24  ;;  %v592_v13 = vld [vmem:[#allocation2 + $0x6] sm:$0x1]  ;;  %v445_v14 = vld [vmem:[#allocation2] sm:$0x1]  ;;  %s1532_s11 = sld [smem:[#allocation6 + $0x4]] }
  0x9a   : > { %393 = vst [vmem:[%s1522_s30] sm:$0xf] %v1257_v12  ;;  %394 = vst [vmem:[%s1522_s30 + $0x4] sm:$0xf] %v1257_v12  ;;  %v674_v15 = vld [vmem:[#allocation2 + $0x7] sm:$0x1]  ;;  %s1534_s0 = sld [smem:[#allocation6 + $0x5]] }
  0x9b   : > { %v446_v16 = vld [vmem:[#allocation2 + $0x4] sm:$0x1]  ;;  %v397_v17 = vld [vmem:[%s348_s27] sm:$0x3]  ;;  %v401_v18 = vld [vmem:[%s332_s12] sm:$0x3] }
  0x9c   : > { %422 = vperm.xlu1 %1048, %v396_v5   ;;  %412 = vperm.xlu0 %1047, %v396_v5   ;;  %v398_v19 = vld [vmem:[%s348_s27 + $0x2] sm:$0x3]  ;;  %v402_v20 = vld [vmem:[%s332_s12 + $0x2] sm:$0x3]  ;;  %s1538_s2 = sld [smem:[#allocation6 + $0x6]]  ;;  %s1540_s14 = sld [smem:[#allocation6 + $0x7]]  ;;  %v1552_v25 = vunpack.c.l.bf16 %v397_v17  ;;  %v403_v26 = vunpack.c.l.bf16 %v401_v18 }
  0x9d   : > { %s1542_s1 = sld [smem:[#allocation6 + $0x8]]  ;;  %s1544_s13 = sld [smem:[#allocation6 + $0x9]]  ;;  %v430_v23 = vld [vmem:[%s340_s15 + $0x2] sm:$0x3]  ;;  %v1554_v27 = vunpack.c.l.bf16 %v398_v19  ;;  %v404_v28 = vunpack.c.l.bf16 %v402_v20  ;;  %v429_v29 = vld [vmem:[%s340_s15] sm:$0x3] }
  0x9e   : > { %s1548_s17 = sld [smem:[#allocation6 + $0xa]]  ;;  %s1550_s25 = sld [smem:[#allocation6 + $0xb]]  ;;  %v432_v32 = vunpack.c.l.bf16 %v430_v23  ;;  %v431_v33 = vunpack.c.l.bf16 %v429_v29  ;;  %v1570_v34 = vshrl.u32 %v577_v24, 7 }
  0x9f   : > { %s1558_s16 = sld [smem:[#allocation6 + $0xc]]  ;;  %s1560_s28 = sld [smem:[#allocation6 + $0xd]]  ;;  %v512_v39 = vstv %s1532_s11 }
  0xa0   : > { %1050 = vset.pattern.permute.xlu1 %v1255_v6  ;;  %1049 = vset.pattern.permute.xlu0 %v1255_v6  ;;  %s1562_s10 = sld [smem:[#allocation6 + $0xe]]  ;;  %s1564_s12 = sld [smem:[#allocation6 + $0xf]]  ;;  %v528_v40 = vstv %s1534_s0  ;;  %v579_v45 = vsub.s32 1, %v1570_v34  ;;  %v661_v61 = vsub.s32 2, %v1570_v34 }
  0xa1   : > { %438 = vperm.xlu1 %1050, %v396_v5   ;;  %434 = vperm.xlu0 %1049, %v395_v2   ;;  %s1566_s27 = sld [smem:[#allocation6]]  ;;  %s1568_s24 = sld [smem:[#allocation6 + $0x1]] }
  0xa2   : > { %s1572_s9 = sld [smem:[#allocation6 + $0x2]]  ;;  %s1574_s15 = sld [smem:[#allocation6 + $0x3]]  ;;  %v540_v41 = vstv %s1538_s2  ;;  %v552_v42 = vstv %s1540_s14 }
  0xa3   : > { %v594_v46 = vstv %s1542_s1  ;;  %v610_v47 = vstv %s1544_s13  ;;  %s954_s11 = sshll.u32 %s1234_s21, 7  ;;  %s769_s0 = sshll.u32 %s1522_s30, 4  ;;  %s1714_s0 = int_to_ptr.vmem [resolvable:$true] %s769_s0 }
  0xa4   : > { %v622_v48 = vstv %s1548_s17  ;;  %v634_v53 = vstv %s1550_s25  ;;  %s1712_s1 = scalar_lea.hbm %s1770_s5, %s954_s11  ;;  %s756_s21 = scalar_lea.sflag [#allocation4], %s1509_s29 }
  0xa5   : > { %1051 = vset.pattern.permute.xlu1 %v1256_v9  ;;  %1052 = vset.pattern.permute.xlu0 %v1256_v9  ;;  %v676_v54 = vstv %s1558_s16  ;;  %v692_v55 = vstv %s1560_s28  ;;  %s1152_s13 = scalar_lea.vmem %s1714_s0, 128  ;;  %p1799_p13 = scmp.ne.s32.totalorder %s1783_s6, 0 }
  0xa6   : > { %517 = vperm.xlu1 %1051, %v509_v7   ;;  %522 = vperm.xlu0 %1052, %v510_v8   ;;  %v704_v56 = vstv %s1562_s10  ;;  %v716_v59 = vstv %s1564_s12  ;;  %p1153_p10 = scmp.ne.s32.totalorder %s1714_s0, %s1152_s13  ;;  %s1258_s17 = smov [#allocation11]  }
  0xa7   : > { %v448_v60 = vstv %s1566_s27  ;;  %v464_v62 = vstv %s1568_s24  ;;  %s1156_s25 = sshll.u32 %s1258_s17, 4  ;;  %s1157_s25 = int_to_ptr.vmem [resolvable:$false] %s1156_s25 }
  0xa8   : > { %v476_v63 = vstv %s1572_s9  ;;  %v488_v0 = vstv %s1574_s15  ;;  %p1154_p1 = pnand %p1153_p10, %p1799_p13  ;;  %s1158_s16 = scalar_lea.vmem %s1157_s25, 256 }
  0xa9   : > { %p1159_p3 = scmp.lt.s32.totalorder %s1714_s0, %s1157_s25  ;;  %p1160_p8 = scmp.lt.s32.totalorder %s1158_s16, %s1152_s13 }
  0xaa   : > { %599 = vperm.xlu1 %1051, %v591_v10   ;;  %681 = vperm.xlu0 %1052, %v673_v11   ;;  %p1155_p6 = pneg %p1154_p1 }
  0xab   : > { %p1161_p4 = por %p1160_p8, %p1159_p3 }
  0xad   : > { %p1162_p5 = pnand %p1161_p4, %p1155_p6 }
  0xae   : > { %604 = vperm.xlu1 %1051, %v592_v13   ;;  %453 = vperm.xlu0 %1052, %v445_v14  }
  0xb2   : > { %686 = vperm.xlu1 %1051, %v674_v15  }
  0xb6   : > { %458 = vperm.xlu1 %1051, %v446_v16  }
 0x117   : > { %v419_v21 = vpop.permute.xlu1 %418  ;;  %v408_v22 = vpop.permute.xlu0 %407 }
 0x118   : > { %v425_v35 = vmul.f32 %v419_v21, %v1552_v25  ;;  %v415_v36 = vmul.f32 %v408_v22, %v403_v26 }
 0x11a   : > { %v427_v49 = vadd.f32 %v425_v35, %v415_v36 }
 0x11b   : > { %v423_v30 = vpop.permute.xlu1 %422  ;;  %v413_v31 = vpop.permute.xlu0 %412 }
 0x11c   : > { %v426_v37 = vmul.f32 %v423_v30, %v1554_v27  ;;  %v416_v38 = vmul.f32 %v413_v31, %v404_v28 }
 0x11e   : > { %v428_v50 = vadd.f32 %v426_v37, %v416_v38 }
 0x120   : > { %v439_v43 = vpop.permute.xlu1 %438  ;;  %v435_v44 = vpop.permute.xlu0 %434 }
 0x121   : > { %v442_v51 = vmul.f32 %v439_v43, %v432_v32  ;;  %v441_v52 = vmul.f32 %v435_v44, %v431_v33 }
 0x123   : > { %v1590_v57 = vadd.f32 %v442_v51, %v428_v50  ;;  %v1592_v58 = vadd.f32 %v441_v52, %v427_v49 }
 0x125   : > { %v518_v1 = vpop.permute.xlu1 %517  ;;  %v513_v2 = vmul.f32 %v512_v39, %v1592_v58  ;;  %v529_v3 = vmul.f32 %v528_v40, %v1592_v58  ;;  %v541_v4 = vmul.f32 %v540_v41, %v1592_v58  ;;  %v553_v5 = vmul.f32 %v552_v42, %v1592_v58  ;;  %v523_v6 = vpop.permute.xlu0 %522 }
 0x126   : > { %v514_v7 = vmul.f32 %v512_v39, %v1590_v57  ;;  %v530_v8 = vmul.f32 %v528_v40, %v1590_v57  ;;  %v542_v9 = vmul.f32 %v540_v41, %v1590_v57  ;;  %v554_v10 = vmul.f32 %v552_v42, %v1590_v57 }
 0x127   : > { %v525_v11 = vadd.f32 %v518_v1, %v513_v2  ;;  %v533_v12 = vrot.slane %v529_v3, 1  ;;  %v545_v13 = vrot.slane %v541_v4, 2  ;;  %v557_v14 = vrot.slane %v553_v5, 3 }
 0x128   : > { %v534_v15 = vrot.slane %v530_v8, 1  ;;  %v546_v16 = vrot.slane %v542_v9, 2  ;;  %v558_v17 = vrot.slane %v554_v10, 3  ;;  %v526_v18 = vadd.f32 %v523_v6, %v514_v7 }
 0x129   : > { %v537_v19 = vadd.f32 %v533_v12, %v525_v11  ;;  %v600_v20 = vpop.permute.xlu1 %599  ;;  %v595_v21 = vmul.f32 %v594_v46, %v1592_v58  ;;  %v611_v22 = vmul.f32 %v610_v47, %v1592_v58  ;;  %v623_v23 = vmul.f32 %v622_v48, %v1592_v58  ;;  %v682_v30 = vpop.permute.xlu0 %681 }
 0x12a   : > { %v538_v24 = vadd.f32 %v534_v15, %v526_v18  ;;  %v635_v26 = vmul.f32 %v634_v53, %v1592_v58  ;;  %v677_v28 = vmul.f32 %v676_v54, %v1592_v58  ;;  %v693_v29 = vmul.f32 %v692_v55, %v1592_v58  ;;  %v573_v18 = vld [vmem:[%s1522_s30 + $0x1] sm:$0x1] }
 0x12b   : > { %v549_v31 = vadd.f32 %v545_v13, %v537_v19  ;;  %v607_v32 = vadd.f32 %v600_v20, %v595_v21  ;;  %v615_v33 = vrot.slane %v611_v22, 1  ;;  %v627_v35 = vrot.slane %v623_v23, 2  ;;  %v574_v23 = vld [vmem:[%s1522_s30 + $0x5] sm:$0x1] }
 0x12c   : > { %v550_v36 = vadd.f32 %v546_v16, %v538_v24  ;;  %v639_v37 = vrot.slane %v635_v26, 3  ;;  %v697_v38 = vrot.slane %v693_v29, 1  ;;  %v705_v39 = vmul.f32 %v704_v56, %v1592_v58 }
 0x12d   : > { %v561_v40 = vadd.f32 %v557_v14, %v549_v31  ;;  %v619_v41 = vadd.f32 %v615_v33, %v607_v32  ;;  %v717_v42 = vmul.f32 %v716_v59, %v1592_v58  ;;  %v689_v43 = vadd.f32 %v682_v30, %v677_v28  ;;  %v605_v44 = vpop.permute.xlu1 %604  ;;  %v454_v29 = vpop.permute.xlu0 %453 }
 0x12e   : > { %v562_v49 = vadd.f32 %v558_v17, %v550_v36  ;;  %v709_v50 = vrot.slane %v705_v39, 2  ;;  %v596_v51 = vmul.f32 %v594_v46, %v1590_v57  ;;  %v612_v52 = vmul.f32 %v610_v47, %v1590_v57 }
 0x12f   : > { %v565_v1 = vrot.slane %v561_v40, 7  ;;  %v631_v2 = vadd.f32 %v627_v35, %v619_v41  ;;  %v721_v3 = vrot.slane %v717_v42, 3  ;;  %v701_v4 = vadd.f32 %v697_v38, %v689_v43  ;;  %v655_v41 = vld [vmem:[%s1522_s30 + $0x2] sm:$0x1] }
 0x130   : > { %v566_v5 = vrot.slane %v562_v49, 7  ;;  %v608_v6 = vadd.f32 %v605_v44, %v596_v51  ;;  %v616_v7 = vrot.slane %v612_v52, 1  ;;  %v624_v8 = vmul.f32 %v622_v48, %v1590_v57  ;;  %v737_v51 = vld [vmem:[%s1522_s30 + $0x3] sm:$0x1] }
 0x131   : > { %v569_v9 = vsub.f32 %v1552_v25, %v565_v1  ;;  %v643_v10 = vadd.f32 %v639_v37, %v631_v2  ;;  %v713_v11 = vadd.f32 %v709_v50, %v701_v4  ;;  %v636_v46 = vmul.f32 %v634_v53, %v1590_v57  ;;  %v687_v30 = vpop.permute.xlu1 %686 }
 0x132   : > { %v570_v47 = vsub.f32 %v1554_v27, %v566_v5  ;;  %v743_v12 = vsub.s32 3, %v1570_v34  ;;  %v620_v13 = vadd.f32 %v616_v7, %v608_v6  ;;  %v628_v14 = vrot.slane %v624_v8, 2 }
 0x133   : > { %v571_v15 = vand.u32 2147483647, %v569_v9  ;;  %v647_v16 = vrot.slane %v643_v10, 6  ;;  %v725_v48 = vadd.f32 %v721_v3, %v713_v11  ;;  %v640_v17 = vrot.slane %v636_v46, 3  ;;  %v656_v11 = vld [vmem:[%s1522_s30 + $0x6] sm:$0x1] }
 0x134   : > { %v572_v19 = vand.u32 2147483647, %v570_v47  ;;  %v632_v20 = vadd.f32 %v628_v14, %v620_v13  ;;  %v465_v21 = vmul.f32 %v464_v62, %v1592_v58  ;;  %v477_v53 = vmul.f32 %v476_v63, %v1592_v58 }
 0x135   : > { %v580_v22 = vrot.slane %v571_v15, %v579_v45  ;;  %v651_v24 = vsub.f32 %v1552_v25, %v647_v16  ;;  %v729_v26 = vrot.slane %v725_v48, 5  ;;  %v449_v28 = vmul.f32 %v448_v60, %v1592_v58  ;;  %v459_v5 = vpop.permute.xlu1 %458 }
 0x136   : > { %v584_v31 = vrot.slane %v572_v19, %v579_v45  ;;  %v644_v32 = vadd.f32 %v640_v17, %v632_v20  ;;  %v469_v33 = vrot.slane %v465_v21, 1  ;;  %v489_v35 = vmul.f32 %v488_v0, %v1592_v58  ;;  %v503_v19 = vld [vmem:[%s1522_s30] sm:$0x1] }
 0x137   : > { %v587_v36 = vadd.f32 %v580_v22, %v573_v18  ;;  %v653_v37 = vand.u32 2147483647, %v651_v24  ;;  %v733_v38 = vsub.f32 %v1552_v25, %v729_v26  ;;  %v481_v39 = vrot.slane %v477_v53, 2 }
 0x138   : > { %v588_v40 = vadd.f32 %v584_v31, %v574_v23  ;;  %v648_v42 = vrot.slane %v644_v32, 6  ;;  %v461_v43 = vadd.f32 %v454_v29, %v449_v28  ;;  %v678_v45 = vmul.f32 %v676_v54, %v1590_v57  ;;  %v738_v28 = vld [vmem:[%s1522_s30 + $0x7] sm:$0x1]  ;;  %v504_v29 = vld [vmem:[%s1522_s30 + $0x4] sm:$0x1] }
 0x139   : > { %589 = vst [vmem:[%s1522_s30 + $0x1] sm:$0x1] %v587_v36  ;;  %v662_v44 = vrot.slane %v653_v37, %v661_v61  ;;  %v735_v49 = vand.u32 2147483647, %v733_v38  ;;  %v694_v58 = vmul.f32 %v692_v55, %v1590_v57  ;;  %v706_v50 = vmul.f32 %v704_v56, %v1590_v57 }
 0x13a   : > { %590 = vst [vmem:[%s1522_s30 + $0x5] sm:$0x1] %v588_v40  ;;  %v652_v52 = vsub.f32 %v1554_v27, %v648_v42  ;;  %v493_v1 = vrot.slane %v489_v35, 3  ;;  %v473_v54 = vadd.f32 %v469_v33, %v461_v43  ;;  %v690_v2 = vadd.f32 %v687_v30, %v678_v45 }
 0x13b   : > { %v669_v3 = vadd.f32 %v662_v44, %v655_v41  ;;  %v744_v4 = vrot.slane %v735_v49, %v743_v12  ;;  %v698_v55 = vrot.slane %v694_v58, 1  ;;  %v718_v56 = vmul.f32 %v716_v59, %v1590_v57 }
 0x13c   : > { %v654_v6 = vand.u32 2147483647, %v652_v52  ;;  %v485_v7 = vadd.f32 %v481_v39, %v473_v54  ;;  %v710_v8 = vrot.slane %v706_v50, 2  ;;  %v450_v9 = vmul.f32 %v448_v60, %v1590_v57 }
 0x13d   : > { %671 = vst [vmem:[%s1522_s30 + $0x2] sm:$0x1] %v669_v3  ;;  %v751_v10 = vadd.f32 %v744_v4, %v737_v51  ;;  %v702_v46 = vadd.f32 %v698_v55, %v690_v2  ;;  %v466_v47 = vmul.f32 %v464_v62, %v1590_v57  ;;  %v478_v59 = vmul.f32 %v476_v63, %v1590_v57 }
 0x13e   : > { %v666_v13 = vrot.slane %v654_v6, %v661_v61  ;;  %v497_v14 = vadd.f32 %v493_v1, %v485_v7  ;;  %v462_v15 = vadd.f32 %v459_v5, %v450_v9  ;;  %v722_v60 = vrot.slane %v718_v56, 3 }
 0x13f   : > { %753 = vst [vmem:[%s1522_s30 + $0x3] sm:$0x1] %v751_v10  ;;  %v714_v16 = vadd.f32 %v710_v8, %v702_v46  ;;  %v470_v48 = vrot.slane %v466_v47, 1  ;;  %v490_v17 = vmul.f32 %v488_v0, %v1590_v57  ;;  %v482_v61 = vrot.slane %v478_v59, 2 }
 0x140   : > { %v670_v18 = vadd.f32 %v666_v13, %v656_v11  ;;  %v499_v62 = vsub.f32 %v1552_v25, %v497_v14 }
 0x141   : > { %v726_v63 = vadd.f32 %v722_v60, %v714_v16  ;;  %v474_v20 = vadd.f32 %v470_v48, %v462_v15  ;;  %v494_v23 = vrot.slane %v490_v17, 3 }
 0x142   : > { %672 = vst [vmem:[%s1522_s30 + $0x6] sm:$0x1] %v670_v18  ;;  %v501_v21 = vand.u32 2147483647, %v499_v62 }
 0x143   : > { %v730_v53 = vrot.slane %v726_v63, 5  ;;  %v486_v22 = vadd.f32 %v482_v61, %v474_v20 }
 0x144   : > { %v505_v24 = vadd.f32 %v503_v19, %v501_v21 }
 0x145   : > { %v734_v57 = vsub.f32 %v1554_v27, %v730_v53  ;;  %v498_v0 = vadd.f32 %v494_v23, %v486_v22 }
 0x146   : > { %507 = vst [vmem:[%s1522_s30] sm:$0x1] %v505_v24 }
 0x147   : > { %v736_v25 = vand.u32 2147483647, %v734_v57  ;;  %v500_v26 = vsub.f32 %v1554_v27, %v498_v0 }
 0x149   : > { %v748_v30 = vrot.slane %v736_v25, %v743_v12  ;;  %v502_v31 = vand.u32 2147483647, %v500_v26 }
 0x14b   : > { %v752_v27 = vadd.f32 %v748_v30, %v738_v28  ;;  %v506_v32 = vadd.f32 %v504_v29, %v502_v31 }
 0x14d   : > { %754 = vst [vmem:[%s1522_s30 + $0x7] sm:$0x1] %v752_v27  ;;  %508 = vst [vmem:[%s1522_s30 + $0x4] sm:$0x1] %v506_v32 }
 0x14e   : > { %1165 = shalt.err (!%p1162_p5)
}
 0x14f   : > { %s1166_s30 = scalar_lea.hbm %s1712_s1, 128  ;;  %s1170_s12 = scalar_lea.hbm %s1770_s5, 256 }
 0x150   : > { %p1167_p9 = scmp.ne.s32.totalorder %s1712_s1, %s1166_s30  ;;  %p1171_p2 = scmp.lt.u32.totalorder %s1712_s1, %s1770_s5 }
 0x151   : > { %p1172_p12 = scmp.lt.u32.totalorder %s1170_s12, %s1166_s30  ;;  %p1174_p1 = scmp.lt.u32.totalorder %s1166_s30, %s1712_s1 }
 0x152   : > { %p1168_p11 = pnand %p1167_p9, %p1799_p13 }
 0x153   : > { %p1173_p10 = por %p1172_p12, %p1171_p2 }
 0x154   : > { %p1169_p0 = pneg %p1168_p11 }
 0x155   : > { %p1175_p6 = por %p1174_p1, %p1173_p10 }
 0x157   : > { %p1176_p3 = pnand %p1175_p6, %p1169_p0 }
 0x159   : > { %1179 = shalt.err (!%p1176_p3)
}
 0x15a   : > { %s1259_s9 = smov 64   ;;  %s1260_s15 = smov 4  }
 0x15b   : > { %967 = dma.vmem_to_hbm [thread:$0]  (%p1799_p13), %s1714_s0, 128, %s1712_s1, %s756_s21, %s1259_s9, %s1259_s9, %s1260_s15  }
 0x15c PF: > { %s784_s11 = sand.u32 1, %s1222_s18   ;;  %p1800_p8 = scmp.ne.s32.totalorder %s1784_s8, 0 }
 0x15d   : > { %s785_s2 = scalar_lea.sflag [#allocation4], %s784_s11 }
 0x15e   : > { %p977_p4 = pnand %p920_p7, %p1800_p8 }
 0x160   : > { %1217 = dma.done.wait (!%p977_p4), %s785_s2, 128  }
 0x161   : > { %1219 = vsyncadd (!%p977_p4), %s785_s2, 4294967168  ;;  %s23_s23 = sadd.s32 1, %s1242_s23   ;;  %s1801_s18 = smov %s1226_s19 }
 0x162   : > { %p20_p5 = scmp.ge.s32.totalorder %s23_s23, 4   ;;  %s1802_s19 = smov %s1230_s20 }
 0x163   : > { %s1803_s20 = smov %s1353_s7  ;;  %s1804_s21 = smov %s1238_s22 }
 0x164   : > { %s1805_s22 = smov %s1807_s26  ;;  %22 = sbr.rel (!%p20_p5) target bundleno = 12 (0xc), region = 152 }
 0x16b   :  { %790 = vsyncpa [#allocation3], 1 }
 0x16c   :  { %792 = vsyncpa [#allocation3 + $0x1], 1 }
 0x16d   :  { %793 = vsyncpa [#allocation8], 1 }
 0x16e   :  { %795 = vsyncpa [#allocation8 + $0x1], 1 }
 0x16f   :  { %796 = vsyncpa [#allocation4], 1 }
 0x170   :  { %798 = vsyncpa [#allocation4 + $0x1], 1 }
 0x171   :  { %799 = vsyncpa [#allocation5], 1 }
 0x172   :  { %801 = vsyncpa [#allocation5 + $0x1], 1 }

</bundles_post_ra>
